<compile_context>
chip_gen: v7x
topology: tpu7x:2x2x1
jax: 0.10.0
libtpu: 0.0.40
codegen_flags: <defaults>
</compile_context>

<pallas_src>
import jax
import jax.numpy as jnp
from jax.experimental import pallas as pl
from jax.experimental.pallas import tpu as pltpu

_LANE = 128


def _round_up(v, m):
    return (v + m - 1) // m * m


def final_layer_kernel(mod_ref, x_ref, w_ref, b_ref, o_ref):
    """One grid step: LayerNorm + modulate + final GEMM for one token tile.

    mod_ref : (1, 2, H) f32   row 0 = shift, row 1 = (1 + scale) for this batch
    x_ref   : (1, TN, H)      token tile of the current batch element
    w_ref   : (H, C_pad) bf16 final linear weight (zero-padded to 128 lanes)
    b_ref   : (1, C_pad) f32  final linear bias (zero-padded)
    o_ref   : (1, TN, C_pad)
    """
    x = x_ref[0].astype(jnp.float32)                       # (TN, H)
    mod = mod_ref[0]                                        # (2, H) f32
    shift = mod[0:1, :]                                     # (1, H)
    scale1 = mod[1:2, :]                                    # (1, H), already 1+scale

    # --- LayerNorm (no affine, eps=1e-6): one-pass stats, f32 ---
    mean = jnp.mean(x, axis=-1, keepdims=True)
    mean_sq = jnp.mean(x * x, axis=-1, keepdims=True)
    var = mean_sq - mean * mean
    inv = jax.lax.rsqrt(var + 1e-6)

    # --- normalize + modulate in one fused elementwise chain ---
    xm = (x - mean) * inv * scale1 + shift                  # (TN, H)

    # --- final projection on the MXU: bf16 operands, f32 accumulation ---
    y = jnp.dot(xm.astype(w_ref.dtype), w_ref[...],
                preferred_element_type=jnp.float32) + b_ref[...]   # (TN, C_pad)

    # Lane-dense (C_pad multiple of 128) unmasked store.
    # TODO(synk): fuse downstream unpatchify here to avoid the padded columns
    # entirely and store the final image layout directly.
    o_ref[0] = y.astype(o_ref.dtype)


def _vmem_budget_bytes():
    """Per-kernel VMEM budget, derived from the chip when queryable."""
    try:
        cap = int(pltpu.get_tpu_info().vmem_capacity_bytes)
    except Exception:
        cap = 64 * 1024 * 1024          # conservative (v7x per-TC) fallback
    # Leave ample headroom for compiler scratch / semaphores / other operands.
    return min(cap // 3, 32 * 1024 * 1024)


def _pick_token_tile(n_tokens, per_token_bytes, fixed_bytes, budget):
    """Largest token tile whose pipelined footprint fits the budget.

    Prefers exact divisors of N (no padding); otherwise the caller pads N up
    to a multiple of the returned tile. Never returns an unbounded TN = N.
    """
    candidates = [t for t in (1024, 512, 256, 128, 64, 32, 16, 8) if t <= n_tokens]
    if not candidates:
        candidates = [max(1, n_tokens)]
    avail = max(budget - fixed_bytes, 0)
    fitting = [t for t in candidates if t * per_token_bytes <= avail]
    if not fitting:
        fitting = [candidates[-1]]      # smallest candidate; vmem_limit sized from it
    for t in fitting:                   # prefer divisors of N (no pad traffic)
        if n_tokens % t == 0:
            return t
    return fitting[0]


def final_layer(x, c, w_ada, b_ada, w_lin, b_lin):
    """x: (B, N, H), c: (B, H), w_ada: (H, 2H), b_ada: (2H,),
    w_lin: (H, C), b_lin: (C,).  Returns (B, N, C)."""
    B, N, H = x.shape
    C = w_lin.shape[1]
    C_pad = _round_up(C, _LANE)

    # ---- adaLN modulation hoisted out of the kernel (tiny (B,H)@(H,2H)) ----
    cf = c.astype(jnp.float32)
    c_silu = cf * jax.nn.sigmoid(cf)
    ada = c_silu @ w_ada.astype(jnp.float32) + b_ada.astype(jnp.float32)   # (B, 2H)
    shift, scale = jnp.split(ada, 2, axis=1)
    mod = jnp.stack([shift, 1.0 + scale], axis=1)           # (B, 2, H) packed, f32

    # ---- lane-dense final projection: pad weight/bias columns to C_pad ----
    w_p = jnp.zeros((H, C_pad), jnp.bfloat16).at[:, :C].set(w_lin.astype(jnp.bfloat16))
    b_p = jnp.zeros((1, C_pad), jnp.float32).at[:, :C].set(b_lin.astype(jnp.float32))

    # ---- token-tile selection with the real per-tile working set ----
    itemsize = x.dtype.itemsize
    per_token = (2 * H * itemsize            # x tile, double-buffered
                 + 2 * C_pad * itemsize      # out tile, double-buffered
                 + 3 * H * 4                 # f32 x / (x-mean)*inv / xm intermediates
                 + H * 2                     # bf16 xm copy for the MXU
                 + C_pad * 4)                # f32 GEMM accumulator
    # TODO(synk): on v7x, load the grid-invariant weight/bias once into scratch
    # instead of letting Pallas double-buffer them (saves ~H*C_pad*2 bytes).
    fixed = (2 * H * C_pad * 2               # bf16 weight (double-buffered, invariant)
             + 2 * C_pad * 4                 # bias
             + 2 * 2 * H * 4)                # packed modulation
    budget = _vmem_budget_bytes()
    TN = _pick_token_tile(N, per_token, fixed, budget)

    # Pad N so TN always divides the token axis (padded rows sliced off below;
    # zero rows are safe through LN: var=0 -> rsqrt(eps), no NaN/Inf).
    N_pad = _round_up(N, TN)
    x_p = x if N_pad == N else jnp.pad(x, ((0, 0), (0, N_pad - N), (0, 0)))
    n_tiles = N_pad // TN

    est = fixed + TN * per_token
    vmem_limit = int(min(max(int(1.5 * est), 16 * 1024 * 1024), 48 * 1024 * 1024))

    out = pl.pallas_call(
        final_layer_kernel,
        out_shape=jax.ShapeDtypeStruct((B, N_pad, C_pad), x.dtype),
        grid_spec=pltpu.PrefetchScalarGridSpec(
            num_scalar_prefetch=0,
            grid=(B, n_tiles),
            in_specs=[
                pl.BlockSpec((1, 2, H), lambda b, n: (b, 0, 0)),     # shift / 1+scale
                pl.BlockSpec((1, TN, H), lambda b, n: (b, n, 0)),    # x token tile
                pl.BlockSpec((H, C_pad), lambda b, n: (0, 0)),       # w_lin (bf16, padded)
                pl.BlockSpec((1, C_pad), lambda b, n: (0, 0)),       # b_lin (padded)
            ],
            out_specs=pl.BlockSpec((1, TN, C_pad), lambda b, n: (b, n, 0)),
        ),
        compiler_params=pltpu.CompilerParams(
            dimension_semantics=("parallel", "parallel"),
            vmem_limit_bytes=vmem_limit),
    )(mod, x_p, w_p, b_p)

    return out[:, :N, :C]


def final_layer_ref(x, c, w_ada, b_ada, w_lin, b_lin):
    """Pure-JAX f32 reference mirroring the PyTorch forward."""
    silu = c * jax.nn.sigmoid(c)
    ada = silu @ w_ada + b_ada
    shift, scale = jnp.split(ada, 2, axis=1)
    mean = x.mean(-1, keepdims=True)
    var = jnp.square(x - mean).mean(-1, keepdims=True)
    xn = (x - mean) / jnp.sqrt(var + 1e-6)
    xm = xn * (1 + scale[:, None, :]) + shift[:, None, :]
    return xm @ w_lin + b_lin


if __name__ == "__main__":
    # Small shapes consistent with the module: batch=2, seq=8, hidden=32, out_channels=8.
    B, N, H, C = 2, 8, 32, 8

    key = jax.random.PRNGKey(0)
    kx, kc, kwa, kba, kwl, kbl = jax.random.split(key, 6)

    x = jax.random.normal(kx, (B, N, H), dtype=jnp.float32)
    c = jax.random.normal(kc, (B, H), dtype=jnp.float32)

    # PyTorch-equivalent parameter shapes, stored as (in, out).
    w_ada = jax.random.normal(kwa, (H, 2 * H), dtype=jnp.float32) * 0.02
    b_ada = jax.random.normal(kba, (2 * H,), dtype=jnp.float32) * 0.02
    w_lin = jax.random.normal(kwl, (H, C), dtype=jnp.float32) * 0.02
    b_lin = jax.random.normal(kbl, (C,), dtype=jnp.float32) * 0.02

    out = jax.block_until_ready(final_layer(x, c, w_ada, b_ada, w_lin, b_lin))
    ref = final_layer_ref(x, c, w_ada, b_ada, w_lin, b_lin)

    assert out.shape == (B, N, C)
    # Kernel uses the bf16 MXU path with f32 accumulation vs the f32 reference,
    # so the tolerance is loosened accordingly.
    assert jnp.allclose(out, ref, atol=2e-2, rtol=2e-2), "mismatch vs reference"

    print("KERNEL_OK")
</pallas_src>

<mosaic_0001>
module attributes {stable_mosaic.version = 11 : i64} {
  func.func @final_layer_kernel(%arg0: i32, %arg1: i32, %arg2: memref<1x2x32xf32, #tpu.memory_space<vmem>>, %arg3: memref<1x8x32xf32, #tpu.memory_space<vmem>>, %arg4: memref<32x128xbf16, #tpu.memory_space<vmem>>, %arg5: memref<1x128xf32, #tpu.memory_space<vmem>>, %arg6: memref<1x8x128xf32, #tpu.memory_space<vmem>>) attributes {dimension_semantics = [#tpu.dimension_semantics<parallel>, #tpu.dimension_semantics<parallel>], iteration_bounds = array<i64: 2, 1>, scalar_prefetch = 0 : i64, scratch_operands = 0 : i64, tpu.core_type = #tpu.core_type<tc>, window_params = [{transform_indices = @transform_0, window_bounds = array<i64: 1, 2, 32>}, {transform_indices = @transform_1, window_bounds = array<i64: 1, 8, 32>}, {pipeline_mode = #tpu.pipeline_mode<synchronous>, transform_indices = @transform_2, window_bounds = array<i64: 32, 128>}, {pipeline_mode = #tpu.pipeline_mode<synchronous>, transform_indices = @transform_3, window_bounds = array<i64: 1, 128>}, {transform_indices = @transform_4, window_bounds = array<i64: 1, 8, 128>}]} {
    %c0 = arith.constant 0 : index
    %c0_0 = arith.constant 0 : index
    %c0_1 = arith.constant 0 : index
    %0 = vector.load %arg3[%c0, %c0_0, %c0_1] : memref<1x8x32xf32, #tpu.memory_space<vmem>>, vector<1x8x32xf32>
    %1 = vector.shape_cast %0 : vector<1x8x32xf32> to vector<8x32xf32>
    %c0_2 = arith.constant 0 : index
    %c0_3 = arith.constant 0 : index
    %c0_4 = arith.constant 0 : index
    %2 = vector.load %arg2[%c0_2, %c0_3, %c0_4] : memref<1x2x32xf32, #tpu.memory_space<vmem>>, vector<1x2x32xf32>
    %3 = vector.shape_cast %2 : vector<1x2x32xf32> to vector<2x32xf32>
    %4 = vector.extract_strided_slice %3 {offsets = [0, 0], sizes = [1, 32], strides = [1, 1]} : vector<2x32xf32> to vector<1x32xf32>
    %5 = vector.extract_strided_slice %3 {offsets = [1, 0], sizes = [1, 32], strides = [1, 1]} : vector<2x32xf32> to vector<1x32xf32>
    %cst = arith.constant dense<0.000000e+00> : vector<8xf32>
    %6 = vector.multi_reduction <add>, %1, %cst [1] : vector<8x32xf32> to vector<8xf32>
    %7 = vector.shape_cast %6 : vector<8xf32> to vector<8x1xf32>
    %cst_5 = arith.constant 3.200000e+01 : f32
    %8 = vector.broadcast %cst_5 : f32 to vector<8x1xf32>
    %9 = arith.divf %7, %8 : vector<8x1xf32>
    %10 = arith.mulf %1, %1 : vector<8x32xf32>
    %cst_6 = arith.constant dense<0.000000e+00> : vector<8xf32>
    %11 = vector.multi_reduction <add>, %10, %cst_6 [1] : vector<8x32xf32> to vector<8xf32>
    %12 = vector.shape_cast %11 : vector<8xf32> to vector<8x1xf32>
    %cst_7 = arith.constant 3.200000e+01 : f32
    %13 = vector.broadcast %cst_7 : f32 to vector<8x1xf32>
    %14 = arith.divf %12, %13 : vector<8x1xf32>
    %15 = arith.mulf %9, %9 : vector<8x1xf32>
    %16 = arith.subf %14, %15 : vector<8x1xf32>
    %cst_8 = arith.constant 9.99999997E-7 : f32
    %17 = vector.broadcast %cst_8 : f32 to vector<8x1xf32>
    %18 = arith.addf %16, %17 : vector<8x1xf32>
    %19 = math.rsqrt %18 : vector<8x1xf32>
    %20 = vector.broadcast %9 : vector<8x1xf32> to vector<8x32xf32>
    %21 = arith.subf %1, %20 : vector<8x32xf32>
    %22 = vector.broadcast %19 : vector<8x1xf32> to vector<8x32xf32>
    %23 = arith.mulf %21, %22 : vector<8x32xf32>
    %24 = vector.broadcast %5 : vector<1x32xf32> to vector<8x32xf32>
    %25 = arith.mulf %23, %24 : vector<8x32xf32>
    %26 = vector.broadcast %4 : vector<1x32xf32> to vector<8x32xf32>
    %27 = arith.addf %25, %26 : vector<8x32xf32>
    %28 = arith.truncf %27 : vector<8x32xf32> to vector<8x32xbf16>
    %c0_9 = arith.constant 0 : index
    %c0_10 = arith.constant 0 : index
    %29 = vector.load %arg4[%c0_9, %c0_10] : memref<32x128xbf16, #tpu.memory_space<vmem>>, vector<32x128xbf16>
    %cst_11 = arith.constant dense<0.000000e+00> : vector<8x128xf32>
    %30 = tpu.matmul %28, %29, %cst_11 {dimension_numbers = #tpu.dot_dimension_numbers<[1], [0], [0], [1], [0, 0, 1, 1], [], []>} : vector<8x32xbf16>, vector<32x128xbf16>, vector<8x128xf32> -> vector<8x128xf32>
    %c0_12 = arith.constant 0 : index
    %c0_13 = arith.constant 0 : index
    %31 = vector.load %arg5[%c0_12, %c0_13] : memref<1x128xf32, #tpu.memory_space<vmem>>, vector<1x128xf32>
    %32 = vector.broadcast %31 : vector<1x128xf32> to vector<8x128xf32>
    %33 = arith.addf %30, %32 : vector<8x128xf32>
    %c0_14 = arith.constant 0 : index
    %c0_15 = arith.constant 0 : index
    %c0_16 = arith.constant 0 : index
    %34 = vector.load %arg6[%c0_14, %c0_15, %c0_16] : memref<1x8x128xf32, #tpu.memory_space<vmem>>, vector<1x8x128xf32>
    %35 = vector.shape_cast %34 : vector<1x8x128xf32> to vector<8x128xf32>
    %36 = vector.shape_cast %33 : vector<8x128xf32> to vector<1x8x128xf32>
    tpu.vector_store %arg6[%c0_14, %c0_15, %c0_16], %36 {strides = array<i32>} : memref<1x8x128xf32, #tpu.memory_space<vmem>>, vector<1x8x128xf32>,
    return
  }
  func.func @transform_0(%arg0: i32, %arg1: i32) -> (i32, i32, i32) {
    %c0_i32 = arith.constant 0 : i32
    %c0_i32_0 = arith.constant 0 : i32
    %c0_i32_1 = arith.constant 0 : i32
    return %arg0, %c0_i32, %c0_i32_0 : i32, i32, i32
  }
  func.func @transform_1(%arg0: i32, %arg1: i32) -> (i32, i32, i32) {
    %c0_i32 = arith.constant 0 : i32
    %c0_i32_0 = arith.constant 0 : i32
    return %arg0, %arg1, %c0_i32 : i32, i32, i32
  }
  func.func @transform_2(%arg0: i32, %arg1: i32) -> (i32, i32) {
    %c0_i32 = arith.constant 0 : i32
    %c0_i32_0 = arith.constant 0 : i32
    %c0_i32_1 = arith.constant 0 : i32
    return %c0_i32, %c0_i32_0 : i32, i32
  }
  func.func @transform_3(%arg0: i32, %arg1: i32) -> (i32, i32) {
    %c0_i32 = arith.constant 0 : i32
    %c0_i32_0 = arith.constant 0 : i32
    %c0_i32_1 = arith.constant 0 : i32
    return %c0_i32, %c0_i32_0 : i32, i32
  }
  func.func @transform_4(%arg0: i32, %arg1: i32) -> (i32, i32, i32) {
    %c0_i32 = arith.constant 0 : i32
    %c0_i32_0 = arith.constant 0 : i32
    return %arg0, %arg1, %c0_i32 : i32, i32, i32
  }
}

</mosaic_0001>

<bundles_post_ra>
// kernel: tpu_custom_call.1
= control target key start
LH: loop header
LB: loop body
LE: loop exit
PB: predicated region body
PF: predicated region fallthrough
CT: control target
= control target key end

     0   :  { %s1102_s0 = inlined_call_operand.hbm [shape: f32[2,2,32], index: 0, kind: input, shape index: {}]   ;;  %s1103_s1 = inlined_call_operand.hbm [shape: f32[2,8,32], index: 1, kind: input, shape index: {}]   ;;  %s1104_s2 = inlined_call_operand.hbm [shape: bf16[32,128], index: 2, kind: input, shape index: {}]   ;;  %s1105_s3 = inlined_call_operand.vmem [shape: f32[1,128], index: 3, kind: input, shape index: {}]   ;;  %s1106_s4 = inlined_call_operand.hbm [shape: f32[2,8,128], index: 4, kind: output, shape index: {}]  }
   0x1   :  { %1111 = sst [smem:[#allocation13_spill]] %s1102_s0 }
   0x2   :  { %1112 = sst [smem:[#allocation14_spill]] %s1104_s2 }
   0x3   :  { %9 = vsyncpa [#allocation3], 0 }
   0x4   :  { %11 = vsyncpa [#allocation3 + $0x1], 0 }
   0x5   :  { %12 = vsyncpa [#allocation6], 0 }
   0x6   :  { %14 = vsyncpa [#allocation6 + $0x1], 0 }
   0x7   :  { %15 = vsyncpa [#allocation4], 0 }
   0x8   :  { %17 = vsyncpa [#allocation4 + $0x1], 0  ;;  %s838_s15 = smov 0   ;;  %s840_s16 = smov 0  }
   0x9   :  { %s842_s17 = smov 0   ;;  %s844_s18 = smov 0  }
   0xa   :  { %s846_s19 = smov 0   ;;  %s848_s20 = smov 0  }
   0xb LB: > { %s869_s21 = sadd.s32 4294967295, %s803_s20   ;;  %s507_s22 = sadd.s32 4294967294, %s803_s20   ;;  %s803_s20 = sphi %s848_s20, %s23_s20   ;;  %s799_s19 = sphi %s846_s19, %s1135_s19   ;;  %s795_s18 = sphi %s844_s18, %s1134_s18   ;;  %s791_s17 = sphi %s842_s17, %s1133_s17   ;;  %s787_s16 = sphi %s840_s16, %s1132_s16   ;;  %s783_s15 = sphi %s838_s15, %s1131_s15  }
   0xc   : > { %p55_p0 = scmp.ne.s32.totalorder %s787_s16, %s783_s15  ;;  %p1107_p1 = scmp.eq.s32.totalorder %s869_s21, 0 }
   0xd   : > { %p157_p3 = scmp.eq.s32.totalorder %s507_s22, 1  ;;  %p508_p5 = scmp.ge.s32.totalorder %s803_s20, 1 }
   0xe   : > { %p878_p4 = por %p1107_p1, %p55_p0  ;;  %p164_p7 = scmp.lt.s32.totalorder %s803_s20, 3 }
   0xf   : > { %p883_p6 = por %p157_p3, %p55_p0  ;;  %s805_s26 = smov [#allocation7]  }
  0x10   : > { %s1113_s23 = scalar_select %p878_p4, 1, 0 }
  0x11   : > { %s1114_s24 = scalar_select %p883_p6, 1, 0 }
  0x12   : > { %p888_p8 = pnand %p508_p5, %p164_p7  ;;  %s176_s27 = sshll.u32 %s805_s26, 4  ;;  %s177_s27 = int_to_ptr.vmem [resolvable:$true] %s176_s27 }
  0x13   : > { %s35_s29 = sadd.s32 1, %s799_s19  ;;  %s1117_s2 = sld [smem:[#allocation14_spill]] }
  0x14   : > { %s1115_s25 = scalar_select %p888_p8, 1, 0 }
  0x15   : > { %p549_p9 = pneg %p888_p8 }
  0x17   : > { %p897_p11 = pnand %p549_p9, %p1107_p1 }
  0x19   : > { %s625_s6 = scalar_lea.hbm %s1117_s2, 256  ;;  %p627_p13 = pneg %p897_p11 }
  0x1a   : > { %p626_p12 = scmp.ne.s32.totalorder %s1117_s2, %s625_s6  ;;  %p632_p5 = scmp.lt.u32.totalorder %s625_s6, %s1117_s2 }
  0x1c   : > { %p628_p0 = pnand %p627_p13, %p626_p12 }
  0x1e   : > { %p629_p3 = pneg %p628_p0 }
  0x20   : > { %p634_p7 = pnand %p632_p5, %p629_p3 }
  0x22   : > { %637 = shalt.err (!%p634_p7)
}
  0x23   : > { %s638_s11 = scalar_lea.vmem %s177_s27, 256  ;;  %p646_p2 = scmp.lt.s32.totalorder %s177_s27, %s177_s27 }
  0x24   : > { %p639_p9 = scmp.ne.s32.totalorder %s177_s27, %s638_s11  ;;  %p647_p6 = scmp.lt.s32.totalorder %s638_s11, %s638_s11 }
  0x26   : > { %p641_p10 = pnand %p639_p9, %p627_p13  ;;  %p648_p4 = por %p647_p6, %p646_p2 }
  0x28   : > { %p642_p1 = pneg %p641_p10 }
  0x2a   : > { %p649_p8 = pnand %p648_p4, %p642_p1 }
  0x2c   : > { %652 = shalt.err (!%p649_p8)
}
  0x2d   : > { %s806_s12 = smov 64   ;;  %s807_s13 = smov 4  }
  0x2e   : > { %552 = dma.hbm_to_vmem [thread:$0]  (!%p897_p11), %s1117_s2, 256, %s177_s27, [#allocation6], %s806_s12, %s806_s12, %s807_s13  }
  0x2f   : > { %p37_p1 = scmp.ge.s32.totalorder %s35_s29, 2  ;;  %s42_s26 = sadd.s32 1, %s791_s17 }
  0x30   : > { %p49_p2 = scmp.ne.s32.totalorder %s791_s17, %s787_s16  ;;  %p50_p4 = scmp.eq.s32.totalorder %s803_s20, 0 }
  0x31   : > { %s1137_s29 = smov (%p37_p1, %s35_s29), 0  ;;  %p1119_p8 = scmp.eq.s32.totalorder %s869_s21, 1 }
  0x32   : > { %p924_p6 = por %p50_p4, %p49_p2  ;;  %s39_s5 = ssub.s32 %s799_s19, %s1137_s29 }
  0x33   : > { %p930_p10 = por %p1119_p8, %p49_p2  ;;  %p565_p11 = scmp.lt.s32.totalorder %s803_s20, 2 }
  0x34   : > { %p40_p12 = scmp.eq.s32.totalorder %s39_s5, 0  ;;  %s938_s27 = sand.u32 1, %s791_s17  }
  0x35   : > { %s1120_s28 = scalar_select %p930_p10, 1, 0 }
  0x36   : > { %s511_s6 = sshll.u32 %s938_s27, 1  ;;  %s512_s8 = sshll.u32 %s799_s19, 5 }
  0x37   : > { %s942_s7 = scalar_select %p40_p12, %s791_s17, %s42_s26  }
  0x38   : > { %s1121_s0 = sld [smem:[#allocation13_spill]]  ;;  %s197_s12 = scalar_lea.vmem [#allocation2], %s511_s6 }
  0x39   : > { %s204_s13 = sshll.u32 %s197_s12, 4  ;;  %p954_p13 = pnand %p565_p11, %p924_p6  ;;  %s950_s13 = int_to_ptr.vmem [resolvable:$true] %s204_s13 }
  0x3a   : > { %s513_s26 = sshll.u32 %s938_s27, 3  ;;  %s194_s5 = scalar_lea.sflag [#allocation3], %s938_s27 }
  0x3b   : > { %p655_p3 = pneg %p954_p13 }
  0x3e   : > { %s948_s11 = scalar_lea.hbm %s1121_s0, %s512_s8  ;;  %s658_s30 = scalar_lea.hbm %s1121_s0, 64 }
  0x3f   : > { %s653_s8 = scalar_lea.hbm %s948_s11, 32  ;;  %p659_p9 = scmp.lt.u32.totalorder %s948_s11, %s1121_s0 }
  0x40   : > { %p654_p0 = scmp.ne.s32.totalorder %s948_s11, %s653_s8  ;;  %p660_p1 = scmp.lt.u32.totalorder %s658_s30, %s653_s8 }
  0x41   : > { %p662_p4 = scmp.lt.u32.totalorder %s653_s8, %s948_s11 }
  0x42   : > { %p656_p5 = pnand %p655_p3, %p654_p0  ;;  %p661_p2 = por %p660_p1, %p659_p9 }
  0x44   : > { %p657_p7 = pneg %p656_p5  ;;  %p663_p6 = por %p662_p4, %p661_p2 }
  0x46   : > { %p664_p8 = pnand %p663_p6, %p657_p7 }
  0x48   : > { %667 = shalt.err (!%p664_p8)
}
  0x49   : > { %s668_s22 = scalar_lea.vmem %s950_s13, 32  ;;  %s808_s6 = smov [#allocation2]  }
  0x4a   : > { %p669_p11 = scmp.ne.s32.totalorder %s950_s13, %s668_s22  ;;  %s673_s9 = sshll.u32 %s808_s6, 4  ;;  %s674_s9 = int_to_ptr.vmem [resolvable:$false] %s673_s9 }
  0x4b   : > { %s675_s10 = scalar_lea.vmem %s674_s9, 64  ;;  %p676_p5 = scmp.lt.s32.totalorder %s950_s13, %s674_s9 }
  0x4c   : > { %p671_p12 = pnand %p669_p11, %p655_p3  ;;  %p677_p9 = scmp.lt.s32.totalorder %s675_s10, %s668_s22 }
  0x4e   : > { %p672_p0 = pneg %p671_p12  ;;  %p678_p1 = por %p677_p9, %p676_p5 }
  0x50   : > { %p679_p2 = pnand %p678_p1, %p672_p0 }
  0x52   : > { %682 = shalt.err (!%p679_p2)
}
  0x53   : > { %556 = dma.hbm_to_vmem [thread:$0]  (!%p954_p13), %s948_s11, 32, %s950_s13, %s194_s5  }
  0x54   : > { %s514_s8 = sshll.u32 %s799_s19, 7  ;;  %s215_s22 = scalar_lea.vmem [#allocation5], %s513_s26 }
  0x55   : > { %s990_s6 = scalar_lea.hbm %s1103_s1, %s514_s8  ;;  %s223_s9 = sshll.u32 %s215_s22, 4  ;;  %s224_s9 = int_to_ptr.vmem [resolvable:$true] %s223_s9 }
  0x56   : > { %s1123_s10 = sand.u32 1, %s803_s20   ;;  %s683_s2 = scalar_lea.hbm %s990_s6, 128 }
  0x57   : > { %s212_s0 = scalar_lea.sflag [#allocation6], %s1123_s10  ;;  %p684_p7 = scmp.ne.s32.totalorder %s990_s6, %s683_s2 }
  0x58   : > { %s688_s5 = scalar_lea.hbm %s1103_s1, 256  ;;  %p689_p8 = scmp.lt.u32.totalorder %s990_s6, %s1103_s1 }
  0x59   : > { %p686_p4 = pnand %p684_p7, %p655_p3  ;;  %p690_p11 = scmp.lt.u32.totalorder %s688_s5, %s683_s2 }
  0x5a   : > { %p692_p0 = scmp.lt.u32.totalorder %s683_s2, %s990_s6 }
  0x5b   : > { %p687_p6 = pneg %p686_p4  ;;  %p691_p12 = por %p690_p11, %p689_p8 }
  0x5d   : > { %p693_p5 = por %p692_p0, %p691_p12 }
  0x5f   : > { %p694_p9 = pnand %p693_p5, %p687_p6 }
  0x61   : > { %697 = shalt.err (!%p694_p9)
}
  0x62   : > { %s698_s26 = scalar_lea.vmem %s224_s9, 128  ;;  %s809_s30 = smov [#allocation5]  }
  0x63   : > { %p699_p1 = scmp.ne.s32.totalorder %s224_s9, %s698_s26  ;;  %s703_s12 = sshll.u32 %s809_s30, 4  ;;  %s704_s12 = int_to_ptr.vmem [resolvable:$false] %s703_s12 }
  0x64   : > { %s705_s22 = scalar_lea.vmem %s704_s12, 256  ;;  %p706_p4 = scmp.lt.s32.totalorder %s224_s9, %s704_s12 }
  0x65   : > { %p701_p2 = pnand %p699_p1, %p655_p3  ;;  %p707_p10 = scmp.lt.s32.totalorder %s705_s22, %s698_s26 }
  0x67   : > { %p702_p7 = pneg %p701_p2  ;;  %p708_p8 = por %p707_p10, %p706_p4 }
  0x69   : > { %p709_p11 = pnand %p708_p8, %p702_p7 }
  0x6b   : > { %712 = shalt.err (!%p709_p11)
}
  0x6c   : > { %559 = dma.hbm_to_vmem [thread:$0]  (!%p954_p13), %s990_s6, 128, %s224_s9, %s212_s0  }
  0x6d   : > { %p1124_p6 = scmp.ne.s32.totalorder %s1115_s25, 0 }
  0x6e   : > { %s1018_s2 = sand.u32 (!%p1124_p6), 1, %s787_s16   ;;  %p1125_p10 = scmp.ne.s32.totalorder (!%p1124_p6), %s1113_s23, 0 }
  0x6f   : > { %232 = sbr.rel (%p1124_p6) target bundleno = 526 (0x20e), region = 36  ;;  %s516_s10 = sshll.u32 (!%p1124_p6), %s1018_s2, 1 }
  0x70   : > { %s235_s11 = scalar_lea.sflag (!%p1124_p6), [#allocation3], %s1018_s2  ;;  %s1022_s13 = scalar_lea.vmem (!%p1124_p6), [#allocation2], %s516_s10 }
  0x76   : > { %766 = dma.done.wait (%p1125_p10), %s235_s11, 32  }
  0x77   : > { %768 = vsyncadd (%p1125_p10), %s235_s11, 4294967264  ;;  %s243_s0 = sand.u32 1, %s869_s21   ;;  %s517_s25 = sshll.u32 %s1018_s2, 3 }
  0x78   : > { %s244_s14 = scalar_lea.sflag [#allocation6], %s243_s0  ;;  %s247_s6 = scalar_lea.vmem [#allocation5], %s517_s25 }
  0x79   : > { %770 = dma.done.wait (%p1125_p10), %s244_s14, 128  }
  0x7a   : > { %772 = vsyncadd (%p1125_p10), %s244_s14, 4294967168  ;;  %p1126_p13 = scmp.eq.s32.totalorder %s869_s21, 0 }
  0x7c   : > { %774 = dma.done.wait (%p1126_p13), [#allocation6], 256   ;;  %p1127_p3 = pmov %p1126_p13 }
  0x7d   : > { %vm284_vm0 = vcmask 261120   ;;  %v282_v0 = vld [vmem:[%s247_s6] sm:$0xff]  ;;  %v621_v4 = vld [vmem:[#allocation7] sm:$0xff]   ;;  %v810_v5 = vmov 0.0   ;;  %vm811_vm1 = vmmov 0   ;;  %v622_v6 = vld [vmem:[#allocation7 + $0x8] sm:$0xff]   ;;  %v301_v13 = vlaneseq }
  0x7e   : > { %776 = vsyncadd (%p1127_p3), [#allocation6], 4294967040  ;;  %v285_v1 = vsel %vm284_vm0, %v282_v0, 0.0  ;;  %v290_v2 = vmul.f32 %v282_v0, %v282_v0  ;;  %531 = vmatprep.subr.bf16.mxu0 %v810_v5  ;;  %535 = vmatprep.mubr.msk.bf16.mxu0 %vm811_vm1, %v810_v5  ;;  %v283_v17 = vld [vmem:[%s1022_s13] sm:$0x3]  ;;  %s525_s9 = sshll.u32 %s795_s18, 7 }
  0x7f   : > { %286 = vadd.xlane.f32.xlu0 %v285_v1  ;;  %532 = vmatpush3.bf16.msra.mxu0 %v621_v4  ;;  %v302_v15 = vshrl.u32 %v301_v13, 7  ;;  %v520_v27 = vld [vmem:[%s1105_s3] ss:$0 sm:$0xff]  ;;  %s280_s5 = scalar_lea.vmem [#allocation8], %s517_s25  ;;  %s1053_s30 = scalar_lea.hbm %s1106_s4, %s525_s9 }
  0x80   : > { %v291_v3 = vsel %vm284_vm0, %v290_v2, 0.0  ;;  %533 = vmatprep.subr.bf16.mxu0 %v810_v5  ;;  %s394_s27 = sshll.u32 %s280_s5, 4  ;;  %s380_s18 = scalar_lea.sflag [#allocation4], %s1018_s2  ;;  %s1055_s27 = int_to_ptr.vmem [resolvable:$true] %s394_s27 }
  0x81   : > { %v303_v16 = vsub.s32 1, %v302_v15  ;;  %v308_v18 = vsub.s32 0, %v302_v15  ;;  %s713_s12 = scalar_lea.vmem %s1055_s27, 128  ;;  %p1128_p0 = scmp.ne.s32.totalorder %s1120_s28, 0 }
  0x82   : > { %p714_p12 = scmp.ne.s32.totalorder %s1055_s27, %s713_s12  ;;  %s812_s22 = smov [#allocation8]  }
  0x83   : > { %292 = vadd.xlane.f32.xlu0 %v291_v3  ;;  %534 = vmatpush3.bf16.msra.mxu0 %v622_v6  ;;  %v304_v20 = vrot.slane %v283_v17, %v303_v16  ;;  %v309_v23 = vrot.slane %v283_v17, %v308_v18  ;;  %s717_s10 = sshll.u32 %s812_s22, 4  ;;  %s718_s10 = int_to_ptr.vmem [resolvable:$false] %s717_s10 }
  0x84   : > { %p715_p5 = pnand %p714_p12, %p1128_p0  ;;  %s719_s11 = scalar_lea.vmem %s718_s10, 256 }
  0x85   : > { %p720_p1 = scmp.lt.s32.totalorder %s1055_s27, %s718_s10  ;;  %p721_p2 = scmp.lt.s32.totalorder %s719_s11, %s713_s12 }
  0x86   : > { %p716_p9 = pneg %p715_p5 }
  0x87   : > { %p722_p7 = por %p721_p2, %p720_p1 }
  0x89   : > { %p723_p4 = pnand %p722_p7, %p716_p9 }
 0x10c   : > { %v287_v7 = vpop.xlane.xlu0 %286 }
 0x10d   : > { %v289_v8 = vmul.f32 0.03125, %v287_v7 }
 0x10f   : > { %v295_v10 = vmul.f32 %v289_v8, %v289_v8  ;;  %v299_v19 = vsub.f32 %v282_v0, %v289_v8 }
 0x110   : > { %v293_v9 = vpop.xlane.xlu0 %292 }
 0x111   : > { %v294_v11 = vmul.f32 0.03125, %v293_v9 }
 0x113   : > { %v296_v12 = vsub.f32 %v294_v11, %v295_v10 }
 0x115   : > { %v297_v14 = vadd.f32 1e-06, %v296_v12 }
 0x117   : > { %623 = vrsqrt.f32 %v297_v14 }
 0x121   : > { %v624_v21 = vpop.eup %623 }
 0x122   : > { %v300_v22 = vmul.f32 %v624_v21, %v299_v19 }
 0x124   : > { %v305_v24 = vmul.f32 %v304_v20, %v300_v22 }
 0x126   : > { %v310_v25 = vadd.f32 %v309_v23, %v305_v24 }
 0x128   : > { %v311_v26 = vpack.c.bf16 %v310_v25, %v310_v25 }
 0x12a   : > { %536 = vmatmul.mubr.msk.bf16.vlgmr.msra.gmra.mrb[0].mxu0 %vm284_vm0, %v311_v26 }
 0x1fd   : > { %v372_v28 = vpop.f32.mrb[0].mxu0 }
 0x1fe   : > { %v373_v29 = vadd.f32 %v520_v27, %v372_v28  ;;  %v537_v30 = vpop.f32.mrb[1].mxu0 }
 0x1ff   : > { %v375_v31 = vpop.f32.mrb[2].mxu0 }
 0x200   : > { %378 = vst [vmem:[%s280_s5] sm:$0xff] %v373_v29  ;;  %v538_v32 = vpop.f32.mrb[3].mxu0 }
 0x201   : > { %726 = shalt.err (!%p723_p4)
}
 0x202   : > { %s727_s2 = scalar_lea.hbm %s1053_s30, 128  ;;  %s731_s25 = scalar_lea.hbm %s1106_s4, 256 }
 0x203   : > { %p728_p8 = scmp.ne.s32.totalorder %s1053_s30, %s727_s2  ;;  %p732_p10 = scmp.lt.u32.totalorder %s1053_s30, %s1106_s4 }
 0x204   : > { %p733_p13 = scmp.lt.u32.totalorder %s731_s25, %s727_s2  ;;  %p735_p12 = scmp.lt.u32.totalorder %s727_s2, %s1053_s30 }
 0x205   : > { %p729_p11 = pnand %p728_p8, %p1128_p0 }
 0x206   : > { %p734_p3 = por %p733_p13, %p732_p10 }
 0x207   : > { %p730_p6 = pneg %p729_p11 }
 0x208   : > { %p736_p5 = por %p735_p12, %p734_p3 }
 0x20a   : > { %p737_p9 = pnand %p736_p5, %p730_p6 }
 0x20c   : > { %740 = shalt.err (!%p737_p9)
}
 0x20d   : > { %547 = dma.vmem_to_hbm [thread:$0]  (%p1128_p0), %s1055_s27, 128, %s1053_s30, %s380_s18  }
 0x20e PF: > { %s406_s21 = sand.u32 1, %s783_s15   ;;  %p1129_p1 = scmp.ne.s32.totalorder %s1114_s24, 0 }
 0x20f   : > { %p1130_p2 = scmp.ge.s32.totalorder %s803_s20, 2  ;;  %s407_s23 = scalar_lea.sflag [#allocation4], %s406_s21 }
 0x211   : > { %p561_p7 = pnand %p1130_p2, %p1129_p1 }
 0x213   : > { %778 = dma.done.wait (!%p561_p7), %s407_s23, 128  }
 0x214   : > { %780 = vsyncadd (!%p561_p7), %s407_s23, 4294967168  ;;  %s23_s20 = sadd.s32 1, %s803_s20   ;;  %s1131_s15 = smov %s787_s16 }
 0x215   : > { %p20_p4 = scmp.ge.s32.totalorder %s23_s20, 4   ;;  %s1132_s16 = smov %s791_s17 }
 0x216   : > { %s1133_s17 = smov %s942_s7  ;;  %s1134_s18 = smov %s799_s19 }
 0x217   : > { %s1135_s19 = smov %s1137_s29  ;;  %22 = sbr.rel (!%p20_p4) target bundleno = 11 (0xb), region = 98 }
 0x21e   :  { %412 = vsyncpa [#allocation3], 1 }
 0x21f   :  { %414 = vsyncpa [#allocation3 + $0x1], 1 }
 0x220   :  { %415 = vsyncpa [#allocation6], 1 }
 0x221   :  { %417 = vsyncpa [#allocation6 + $0x1], 1 }
 0x222   :  { %418 = vsyncpa [#allocation4], 1 }
 0x223   :  { %420 = vsyncpa [#allocation4 + $0x1], 1 }

</bundles_post_ra>
